<compile_context>
chip_gen: v7x
topology: tpu7x:2x2x1
jax: 0.10.0
libtpu: 0.0.40
codegen_flags: <defaults>
</compile_context>

<pallas_src>
import functools

import jax
import jax.numpy as jnp
from jax.experimental import pallas as pl
from jax.experimental.pallas import tpu as pltpu

HIDDEN = 128
LEAKY_SLOPE = 0.01  # torch.nn.LeakyReLU default negative_slope


def _leaky_relu(x):
    # maximum(x, a*x) == where(x > 0, x, a*x) for 0 < a < 1.
    return jnp.maximum(x, LEAKY_SLOPE * x)


def _round_up(x, m):
    return ((x + m - 1) // m) * m


# ---------------------------------------------------------------------------
# One-time parameter packing (off the hot path).
# ---------------------------------------------------------------------------
def pack_ensemble_params(w1, b1, w2, b2, w3, b3, matmul_dtype=jnp.bfloat16):
    """Pack raw per-member weights into the kernel layout.

    Raw layout (PyTorch (out,in) already transposed to (in,out)):
      w1: (n, D_in, H)  b1: (n, 1, H)
      w2: (n, H, H)     b2: (n, 1, H)
      w3: (n, H, O)     b3: (n, 1, O)
    """
    n, d_in, hidden = w1.shape
    out_dim = w3.shape[-1]
    assert hidden % 128 == 0, "hidden must be a multiple of 128 lanes"

    # Layer 1: fused across members -> (D_in, n*H).
    w1p = jnp.transpose(w1, (1, 0, 2)).reshape(d_in, n * hidden)
    w1p = w1p.astype(matmul_dtype)
    b1p = jnp.transpose(b1, (1, 0, 2)).reshape(1, n * hidden).astype(jnp.float32)

    # Layer 2: per-member 128x128 tiles (MXU-native on every generation).
    w2p = w2.astype(matmul_dtype)
    b2p = b2.astype(jnp.float32)

    # Layer 3: block-diagonal across members -> single lane-dense output slab.
    out_pad = _round_up(n * out_dim, 128)
    w3_bd = jnp.zeros((n * hidden, out_pad), w3.dtype)
    for i in range(n):
        w3_bd = w3_bd.at[i * hidden:(i + 1) * hidden,
                         i * out_dim:(i + 1) * out_dim].set(w3[i])
    w3p = w3_bd.astype(matmul_dtype)
    b3p = jnp.zeros((1, out_pad), jnp.float32)
    b3p = b3p.at[:, :n * out_dim].set(
        b3.reshape(1, n * out_dim).astype(jnp.float32))
    return w1p, b1p, w2p, b2p, w3p, b3p


# ---------------------------------------------------------------------------
# Batch-tile selection: largest tile that fits the VMEM budget, >=2 grid steps
# when batch allows (v7x megacore), minimal zero-row padding.
# ---------------------------------------------------------------------------
def _pick_batch_tile(batch, n, hidden, out_pad, d_in,
                     vmem_budget_bytes=16 * 1024 * 1024, max_tile=1024):
    per_row = (
        2 * max(d_in, 128) * 4        # input tile (double-buffered, lane-padded)
        + 2 * out_pad * 4             # output tile (double-buffered, f32)
        + n * hidden * 12             # h1/h2 intermediates (f32 + bf16 copies)
    )
    cap = vmem_budget_bytes // per_row
    cap = max(8, min(max_tile, (cap // 8) * 8))
    if batch <= 8:
        steps = 1
    else:
        steps = max(2, pl.cdiv(batch, cap))   # keep both v7x TCs busy
    tb = min(cap, _round_up(pl.cdiv(batch, steps), 8))
    grid_b = pl.cdiv(batch, tb)
    return tb, grid_b


# ---------------------------------------------------------------------------
# Kernel: one grid step = one batch tile; all n ensemble members inside.
# ---------------------------------------------------------------------------
def _ensemble_kernel(x_ref, w1_ref, b1_ref, w2_ref, b2_ref, w3_ref, b3_ref,
                     o_ref, *, n, hidden):
    """
    x_ref : (TB, D_in)            w1_ref: (D_in, n*H)     b1_ref: (1, n*H)
    w2_ref: (n, H, H)             b2_ref: (n, 1, H)
    w3_ref: (n*H, OUTP)           b3_ref: (1, OUTP)
    o_ref : (TB, OUTP)
    """
    mm_dtype = w2_ref.dtype

    # Layer 1: one lane-dense MXU pass covering every ensemble member.
    h1 = jnp.dot(x_ref[...], w1_ref[...], preferred_element_type=jnp.float32)
    h1 = _leaky_relu(h1 + b1_ref[...]).astype(mm_dtype)   # cast once (TB, n*H)

    # Layer 2: per member (128x128 is MXU-native everywhere). Each result is a
    # full 128-lane chunk, so re-packing along lanes needs no relayout.
    h2_parts = []
    for i in range(n):
        h1_i = h1[:, i * hidden:(i + 1) * hidden]
        h2_i = jnp.dot(h1_i, w2_ref[i], preferred_element_type=jnp.float32)
        h2_parts.append(_leaky_relu(h2_i + b2_ref[i]).astype(mm_dtype))
    h2 = jnp.concatenate(h2_parts, axis=-1)               # (TB, n*H)

    # Layer 3: block-diagonal weight -> single lane-dense packed output store.
    out = jnp.dot(h2, w3_ref[...], preferred_element_type=jnp.float32)
    o_ref[...] = (out + b3_ref[...]).astype(o_ref.dtype)


# ---------------------------------------------------------------------------
# Jitted forward: only the (tiny) concat/pad, the pallas_call and the small
# packed-output unshuffle are on the hot path.
# ---------------------------------------------------------------------------
@jax.jit
def ensemble_forward(obs, action, packed_params):
    w1p, b1p, w2p, b2p, w3p, b3p = packed_params
    n, hidden = w2p.shape[0], w2p.shape[1]
    d_in = w1p.shape[0]
    out_pad = w3p.shape[1]
    out_dim = obs.shape[-1]            # final Linear maps back to obs_dim
    batch = obs.shape[0]
    mm_dtype = w1p.dtype
    out_dtype = obs.dtype
    assert d_in == obs.shape[-1] + action.shape[-1]

    x = jnp.concatenate([obs, action], axis=-1).astype(mm_dtype)

    tb, grid_b = _pick_batch_tile(batch, n, hidden, out_pad, d_in)
    b_pad = tb * grid_b
    if b_pad != batch:
        x = jnp.pad(x, ((0, b_pad - batch), (0, 0)))

    kernel = functools.partial(_ensemble_kernel, n=n, hidden=hidden)

    out = pl.pallas_call(
        kernel,
        out_shape=jax.ShapeDtypeStruct((b_pad, out_pad), out_dtype),
        grid_spec=pltpu.PrefetchScalarGridSpec(
            num_scalar_prefetch=0,
            grid=(grid_b,),
            in_specs=[
                pl.BlockSpec((tb, d_in), lambda b: (b, 0)),
                # Weights: full arrays, grid-invariant (fetched once, VMEM-resident).
                pl.BlockSpec((d_in, n * hidden), lambda b: (0, 0)),
                pl.BlockSpec((1, n * hidden), lambda b: (0, 0)),
                pl.BlockSpec((n, hidden, hidden), lambda b: (0, 0, 0)),
                pl.BlockSpec((n, 1, hidden), lambda b: (0, 0, 0)),
                pl.BlockSpec((n * hidden, out_pad), lambda b: (0, 0)),
                pl.BlockSpec((1, out_pad), lambda b: (0, 0)),
            ],
            out_specs=pl.BlockSpec((tb, out_pad), lambda b: (b, 0)),
        ),
        compiler_params=pltpu.CompilerParams(
            dimension_semantics=("parallel",),
            vmem_limit_bytes=32 * 1024 * 1024),
    )(x, w1p, b1p, w2p, b2p, w3p, b3p)

    # Unpack the small lane-packed slab back to the PyTorch layout (n, B, obs).
    out = out[:batch, :n * out_dim]
    return jnp.transpose(out.reshape(batch, n, out_dim), (1, 0, 2))


# ---------------------------------------------------------------------------
# Init + pure-JAX reference (for correctness checking).
# ---------------------------------------------------------------------------
def init_ensemble_params(key, n, obs_dim, action_dim, dtype=jnp.float32):
    """Mimics torch.nn.Linear default init (uniform +-1/sqrt(fan_in))."""
    d_in = obs_dim + action_dim

    def linear(key, fan_in, fan_out):
        kw, kb = jax.random.split(key)
        bound = float(fan_in) ** -0.5
        w = jax.random.uniform(kw, (n, fan_in, fan_out), dtype, -bound, bound)
        b = jax.random.uniform(kb, (n, 1, fan_out), dtype, -bound, bound)
        return w, b

    k1, k2, k3 = jax.random.split(key, 3)
    w1, b1 = linear(k1, d_in, HIDDEN)
    w2, b2 = linear(k2, HIDDEN, HIDDEN)
    w3, b3 = linear(k3, HIDDEN, obs_dim)
    return w1, b1, w2, b2, w3, b3


def _reference_forward(obs, action, w1, b1, w2, b2, w3, b3,
                       matmul_dtype=jnp.float32):
    """Pure-JAX reference with the same operand dtypes / f32 accumulation."""
    hp = jax.lax.Precision.HIGHEST
    x = jnp.concatenate([obs, action], axis=-1).astype(matmul_dtype)
    h1 = jnp.einsum("bd,ndh->nbh", x, w1.astype(matmul_dtype),
                    preferred_element_type=jnp.float32, precision=hp)
    h1 = _leaky_relu(h1 + b1.astype(jnp.float32)).astype(matmul_dtype)
    h2 = jnp.einsum("nbh,nhk->nbk", h1, w2.astype(matmul_dtype),
                    preferred_element_type=jnp.float32, precision=hp)
    h2 = _leaky_relu(h2 + b2.astype(jnp.float32)).astype(matmul_dtype)
    out = jnp.einsum("nbh,nho->nbo", h2, w3.astype(matmul_dtype),
                     preferred_element_type=jnp.float32, precision=hp)
    return out + b3.astype(jnp.float32)


# TODO(synk): training-only pieces of the module (Adam optimizer, MSE ensemble
# loss, .update()) are host-side / autograd features with no forward-pass
# Pallas equivalent and are intentionally not implemented here.
if __name__ == "__main__":
    key = jax.random.PRNGKey(0)

    def run_case(n, batch, obs_dim, action_dim, case_key):
        k_obs, k_act, k_p = jax.random.split(case_key, 3)
        obs = jax.random.normal(k_obs, (batch, obs_dim), jnp.float32)
        action = jax.random.normal(k_act, (batch, action_dim), jnp.float32)
        raw = init_ensemble_params(k_p, n, obs_dim, action_dim)

        # 1) f32 semantics (matches the PyTorch module numerics).
        packed32 = pack_ensemble_params(*raw, matmul_dtype=jnp.float32)
        out32 = jax.block_until_ready(ensemble_forward(obs, action, packed32))
        ref32 = _reference_forward(obs, action, *raw, matmul_dtype=jnp.float32)
        assert out32.shape == (n, batch, obs_dim), out32.shape
        assert jnp.allclose(out32, ref32, atol=1e-2, rtol=1e-2), \
            "f32 kernel mismatch vs reference"

        # 2) Performance path: bf16 matmul operands, f32 MXU accumulation.
        packed16 = pack_ensemble_params(*raw, matmul_dtype=jnp.bfloat16)
        out16 = jax.block_until_ready(ensemble_forward(obs, action, packed16))
        ref16 = _reference_forward(obs, action, *raw, matmul_dtype=jnp.bfloat16)
        assert out16.shape == (n, batch, obs_dim), out16.shape
        assert jnp.allclose(out16, ref16, atol=1.5e-1, rtol=1.5e-1), \
            "bf16 kernel mismatch vs bf16 reference"

    k1, k2 = jax.random.split(key)
    # Small shapes consistent with the module's forward.
    run_case(n=4, batch=8, obs_dim=16, action_dim=4, case_key=k1)
    # Exercise a multi-step grid + batch padding + non-trivial output packing.
    run_case(n=3, batch=20, obs_dim=10, action_dim=6, case_key=k2)

    print("KERNEL_OK")
</pallas_src>

<mosaic_0001>
module attributes {stable_mosaic.version = 11 : i64} {
  func.func @_ensemble_kernel(%arg0: i32, %arg1: memref<8x20xf32, #tpu.memory_space<vmem>>, %arg2: memref<20x512xf32, #tpu.memory_space<vmem>>, %arg3: memref<1x512xf32, #tpu.memory_space<vmem>>, %arg4: memref<4x128x128xf32, #tpu.memory_space<vmem>>, %arg5: memref<4x1x128xf32, #tpu.memory_space<vmem>>, %arg6: memref<512x128xf32, #tpu.memory_space<vmem>>, %arg7: memref<1x128xf32, #tpu.memory_space<vmem>>, %arg8: memref<8x128xf32, #tpu.memory_space<vmem>>) attributes {dimension_semantics = [#tpu.dimension_semantics<parallel>], iteration_bounds = array<i64: 1>, scalar_prefetch = 0 : i64, scratch_operands = 0 : i64, tpu.core_type = #tpu.core_type<tc>, window_params = [{transform_indices = @transform_0, window_bounds = array<i64: 8, 20>}, {pipeline_mode = #tpu.pipeline_mode<synchronous>, transform_indices = @transform_1, window_bounds = array<i64: 20, 512>}, {pipeline_mode = #tpu.pipeline_mode<synchronous>, transform_indices = @transform_2, window_bounds = array<i64: 1, 512>}, {pipeline_mode = #tpu.pipeline_mode<synchronous>, transform_indices = @transform_3, window_bounds = array<i64: 4, 128, 128>}, {pipeline_mode = #tpu.pipeline_mode<synchronous>, transform_indices = @transform_4, window_bounds = array<i64: 4, 1, 128>}, {pipeline_mode = #tpu.pipeline_mode<synchronous>, transform_indices = @transform_5, window_bounds = array<i64: 512, 128>}, {pipeline_mode = #tpu.pipeline_mode<synchronous>, transform_indices = @transform_6, window_bounds = array<i64: 1, 128>}, {transform_indices = @transform_7, window_bounds = array<i64: 8, 128>}]} {
    %c0 = arith.constant 0 : index
    %c0_0 = arith.constant 0 : index
    %0 = vector.load %arg1[%c0, %c0_0] : memref<8x20xf32, #tpu.memory_space<vmem>>, vector<8x20xf32>
    %c0_1 = arith.constant 0 : index
    %c0_2 = arith.constant 0 : index
    %1 = vector.load %arg2[%c0_1, %c0_2] : memref<20x512xf32, #tpu.memory_space<vmem>>, vector<20x512xf32>
    %cst = arith.constant dense<0.000000e+00> : vector<8x512xf32>
    %2 = tpu.matmul %0, %1, %cst {dimension_numbers = #tpu.dot_dimension_numbers<[1], [0], [0], [1], [0, 0, 1, 1], [], []>} : vector<8x20xf32>, vector<20x512xf32>, vector<8x512xf32> -> vector<8x512xf32>
    %c0_3 = arith.constant 0 : index
    %c0_4 = arith.constant 0 : index
    %3 = vector.load %arg3[%c0_3, %c0_4] : memref<1x512xf32, #tpu.memory_space<vmem>>, vector<1x512xf32>
    %4 = vector.broadcast %3 : vector<1x512xf32> to vector<8x512xf32>
    %5 = arith.addf %2, %4 : vector<8x512xf32>
    %cst_5 = arith.constant 0.00999999977 : f32
    %6 = vector.broadcast %cst_5 : f32 to vector<8x512xf32>
    %7 = arith.mulf %6, %5 : vector<8x512xf32>
    %8 = arith.maximumf %5, %7 : vector<8x512xf32>
    %9 = vector.extract_strided_slice %8 {offsets = [0, 0], sizes = [8, 128], strides = [1, 1]} : vector<8x512xf32> to vector<8x128xf32>
    %c0_6 = arith.constant 0 : index
    %c0_7 = arith.constant 0 : index
    %c0_8 = arith.constant 0 : index
    %10 = vector.load %arg4[%c0_6, %c0_7, %c0_8] : memref<4x128x128xf32, #tpu.memory_space<vmem>>, vector<1x128x128xf32>
    %11 = vector.shape_cast %10 : vector<1x128x128xf32> to vector<128x128xf32>
    %cst_9 = arith.constant dense<0.000000e+00> : vector<8x128xf32>
    %12 = tpu.matmul %9, %11, %cst_9 {dimension_numbers = #tpu.dot_dimension_numbers<[1], [0], [0], [1], [0, 0, 1, 1], [], []>} : vector<8x128xf32>, vector<128x128xf32>, vector<8x128xf32> -> vector<8x128xf32>
    %c0_10 = arith.constant 0 : index
    %c0_11 = arith.constant 0 : index
    %c0_12 = arith.constant 0 : index
    %13 = vector.load %arg5[%c0_10, %c0_11, %c0_12] : memref<4x1x128xf32, #tpu.memory_space<vmem>>, vector<1x1x128xf32>
    %14 = vector.shape_cast %13 : vector<1x1x128xf32> to vector<1x128xf32>
    %15 = vector.broadcast %14 : vector<1x128xf32> to vector<8x128xf32>
    %16 = arith.addf %12, %15 : vector<8x128xf32>
    %cst_13 = arith.constant 0.00999999977 : f32
    %17 = vector.broadcast %cst_13 : f32 to vector<8x128xf32>
    %18 = arith.mulf %17, %16 : vector<8x128xf32>
    %19 = arith.maximumf %16, %18 : vector<8x128xf32>
    %20 = vector.extract_strided_slice %8 {offsets = [0, 128], sizes = [8, 128], strides = [1, 1]} : vector<8x512xf32> to vector<8x128xf32>
    %c1 = arith.constant 1 : index
    %c0_14 = arith.constant 0 : index
    %c0_15 = arith.constant 0 : index
    %21 = vector.load %arg4[%c1, %c0_14, %c0_15] : memref<4x128x128xf32, #tpu.memory_space<vmem>>, vector<1x128x128xf32>
    %22 = vector.shape_cast %21 : vector<1x128x128xf32> to vector<128x128xf32>
    %cst_16 = arith.constant dense<0.000000e+00> : vector<8x128xf32>
    %23 = tpu.matmul %20, %22, %cst_16 {dimension_numbers = #tpu.dot_dimension_numbers<[1], [0], [0], [1], [0, 0, 1, 1], [], []>} : vector<8x128xf32>, vector<128x128xf32>, vector<8x128xf32> -> vector<8x128xf32>
    %c1_17 = arith.constant 1 : index
    %c0_18 = arith.constant 0 : index
    %c0_19 = arith.constant 0 : index
    %24 = vector.load %arg5[%c1_17, %c0_18, %c0_19] : memref<4x1x128xf32, #tpu.memory_space<vmem>>, vector<1x1x128xf32>
    %25 = vector.shape_cast %24 : vector<1x1x128xf32> to vector<1x128xf32>
    %26 = vector.broadcast %25 : vector<1x128xf32> to vector<8x128xf32>
    %27 = arith.addf %23, %26 : vector<8x128xf32>
    %cst_20 = arith.constant 0.00999999977 : f32
    %28 = vector.broadcast %cst_20 : f32 to vector<8x128xf32>
    %29 = arith.mulf %28, %27 : vector<8x128xf32>
    %30 = arith.maximumf %27, %29 : vector<8x128xf32>
    %31 = vector.extract_strided_slice %8 {offsets = [0, 256], sizes = [8, 128], strides = [1, 1]} : vector<8x512xf32> to vector<8x128xf32>
    %c2 = arith.constant 2 : index
    %c0_21 = arith.constant 0 : index
    %c0_22 = arith.constant 0 : index
    %32 = vector.load %arg4[%c2, %c0_21, %c0_22] : memref<4x128x128xf32, #tpu.memory_space<vmem>>, vector<1x128x128xf32>
    %33 = vector.shape_cast %32 : vector<1x128x128xf32> to vector<128x128xf32>
    %cst_23 = arith.constant dense<0.000000e+00> : vector<8x128xf32>
    %34 = tpu.matmul %31, %33, %cst_23 {dimension_numbers = #tpu.dot_dimension_numbers<[1], [0], [0], [1], [0, 0, 1, 1], [], []>} : vector<8x128xf32>, vector<128x128xf32>, vector<8x128xf32> -> vector<8x128xf32>
    %c2_24 = arith.constant 2 : index
    %c0_25 = arith.constant 0 : index
    %c0_26 = arith.constant 0 : index
    %35 = vector.load %arg5[%c2_24, %c0_25, %c0_26] : memref<4x1x128xf32, #tpu.memory_space<vmem>>, vector<1x1x128xf32>
    %36 = vector.shape_cast %35 : vector<1x1x128xf32> to vector<1x128xf32>
    %37 = vector.broadcast %36 : vector<1x128xf32> to vector<8x128xf32>
    %38 = arith.addf %34, %37 : vector<8x128xf32>
    %cst_27 = arith.constant 0.00999999977 : f32
    %39 = vector.broadcast %cst_27 : f32 to vector<8x128xf32>
    %40 = arith.mulf %39, %38 : vector<8x128xf32>
    %41 = arith.maximumf %38, %40 : vector<8x128xf32>
    %42 = vector.extract_strided_slice %8 {offsets = [0, 384], sizes = [8, 128], strides = [1, 1]} : vector<8x512xf32> to vector<8x128xf32>
    %c3 = arith.constant 3 : index
    %c0_28 = arith.constant 0 : index
    %c0_29 = arith.constant 0 : index
    %43 = vector.load %arg4[%c3, %c0_28, %c0_29] : memref<4x128x128xf32, #tpu.memory_space<vmem>>, vector<1x128x128xf32>
    %44 = vector.shape_cast %43 : vector<1x128x128xf32> to vector<128x128xf32>
    %cst_30 = arith.constant dense<0.000000e+00> : vector<8x128xf32>
    %45 = tpu.matmul %42, %44, %cst_30 {dimension_numbers = #tpu.dot_dimension_numbers<[1], [0], [0], [1], [0, 0, 1, 1], [], []>} : vector<8x128xf32>, vector<128x128xf32>, vector<8x128xf32> -> vector<8x128xf32>
    %c3_31 = arith.constant 3 : index
    %c0_32 = arith.constant 0 : index
    %c0_33 = arith.constant 0 : index
    %46 = vector.load %arg5[%c3_31, %c0_32, %c0_33] : memref<4x1x128xf32, #tpu.memory_space<vmem>>, vector<1x1x128xf32>
    %47 = vector.shape_cast %46 : vector<1x1x128xf32> to vector<1x128xf32>
    %48 = vector.broadcast %47 : vector<1x128xf32> to vector<8x128xf32>
    %49 = arith.addf %45, %48 : vector<8x128xf32>
    %cst_34 = arith.constant 0.00999999977 : f32
    %50 = vector.broadcast %cst_34 : f32 to vector<8x128xf32>
    %51 = arith.mulf %50, %49 : vector<8x128xf32>
    %52 = arith.maximumf %49, %51 : vector<8x128xf32>
    %53 = tpu.concatenate %19, %30, %41, %52 in 1 : vector<8x128xf32>, vector<8x128xf32>, vector<8x128xf32>, vector<8x128xf32> -> vector<8x512xf32>
    %c0_35 = arith.constant 0 : index
    %c0_36 = arith.constant 0 : index
    %54 = vector.load %arg6[%c0_35, %c0_36] : memref<512x128xf32, #tpu.memory_space<vmem>>, vector<512x128xf32>
    %cst_37 = arith.constant dense<0.000000e+00> : vector<8x128xf32>
    %55 = tpu.matmul %53, %54, %cst_37 {dimension_numbers = #tpu.dot_dimension_numbers<[1], [0], [0], [1], [0, 0, 1, 1], [], []>} : vector<8x512xf32>, vector<512x128xf32>, vector<8x128xf32> -> vector<8x128xf32>
    %c0_38 = arith.constant 0 : index
    %c0_39 = arith.constant 0 : index
    %56 = vector.load %arg7[%c0_38, %c0_39] : memref<1x128xf32, #tpu.memory_space<vmem>>, vector<1x128xf32>
    %57 = vector.broadcast %56 : vector<1x128xf32> to vector<8x128xf32>
    %58 = arith.addf %55, %57 : vector<8x128xf32>
    %c0_40 = arith.constant 0 : index
    %c0_41 = arith.constant 0 : index
    %59 = vector.load %arg8[%c0_40, %c0_41] : memref<8x128xf32, #tpu.memory_space<vmem>>, vector<8x128xf32>
    tpu.vector_store %arg8[%c0_40, %c0_41], %58 {strides = array<i32>} : memref<8x128xf32, #tpu.memory_space<vmem>>, vector<8x128xf32>,
    return
  }
  func.func @transform_0(%arg0: i32) -> (i32, i32) {
    %c0_i32 = arith.constant 0 : i32
    %c0_i32_0 = arith.constant 0 : i32
    return %arg0, %c0_i32 : i32, i32
  }
  func.func @transform_1(%arg0: i32) -> (i32, i32) {
    %c0_i32 = arith.constant 0 : i32
    %c0_i32_0 = arith.constant 0 : i32
    %c0_i32_1 = arith.constant 0 : i32
    return %c0_i32, %c0_i32_0 : i32, i32
  }
  func.func @transform_2(%arg0: i32) -> (i32, i32) {
    %c0_i32 = arith.constant 0 : i32
    %c0_i32_0 = arith.constant 0 : i32
    %c0_i32_1 = arith.constant 0 : i32
    return %c0_i32, %c0_i32_0 : i32, i32
  }
  func.func @transform_3(%arg0: i32) -> (i32, i32, i32) {
    %c0_i32 = arith.constant 0 : i32
    %c0_i32_0 = arith.constant 0 : i32
    %c0_i32_1 = arith.constant 0 : i32
    %c0_i32_2 = arith.constant 0 : i32
    return %c0_i32, %c0_i32_0, %c0_i32_1 : i32, i32, i32
  }
  func.func @transform_4(%arg0: i32) -> (i32, i32, i32) {
    %c0_i32 = arith.constant 0 : i32
    %c0_i32_0 = arith.constant 0 : i32
    %c0_i32_1 = arith.constant 0 : i32
    %c0_i32_2 = arith.constant 0 : i32
    return %c0_i32, %c0_i32_0, %c0_i32_1 : i32, i32, i32
  }
  func.func @transform_5(%arg0: i32) -> (i32, i32) {
    %c0_i32 = arith.constant 0 : i32
    %c0_i32_0 = arith.constant 0 : i32
    %c0_i32_1 = arith.constant 0 : i32
    return %c0_i32, %c0_i32_0 : i32, i32
  }
  func.func @transform_6(%arg0: i32) -> (i32, i32) {
    %c0_i32 = arith.constant 0 : i32
    %c0_i32_0 = arith.constant 0 : i32
    %c0_i32_1 = arith.constant 0 : i32
    return %c0_i32, %c0_i32_0 : i32, i32
  }
  func.func @transform_7(%arg0: i32) -> (i32, i32) {
    %c0_i32 = arith.constant 0 : i32
    %c0_i32_0 = arith.constant 0 : i32
    return %arg0, %c0_i32 : i32, i32
  }
}

</mosaic_0001>

<bundles_post_ra>
// kernel: ensemble_forward.1
= control target key start
LH: loop header
LB: loop body
LE: loop exit
PB: predicated region body
PF: predicated region fallthrough
CT: control target
= control target key end

     0   :  { %12 = vsyncpa [#allocation3], 0  ;;  %s1595_s0 = inlined_call_operand.vmem [shape: f32[8,20], index: 0, kind: input, shape index: {}]   ;;  %s1596_s1 = inlined_call_operand.hbm [shape: f32[20,512], index: 1, kind: input, shape index: {}]   ;;  %s1597_s2 = inlined_call_operand.vmem [shape: f32[1,512], index: 2, kind: input, shape index: {}]   ;;  %s1598_s3 = inlined_call_operand.hbm [shape: f32[4,128,128], index: 3, kind: input, shape index: {}]   ;;  %s1599_s4 = inlined_call_operand.vmem [shape: f32[4,1,128], index: 4, kind: input, shape index: {}]   ;;  %s1600_s5 = inlined_call_operand.hbm [shape: f32[512,128], index: 5, kind: input, shape index: {}]   ;;  %s1601_s6 = inlined_call_operand.vmem [shape: f32[1,128], index: 6, kind: input, shape index: {}]   ;;  %s1602_s7 = inlined_call_operand.vmem [shape: f32[8,128], index: 7, kind: output, shape index: {}]  }
   0x1   :  { %13 = vsyncpa [#allocation5], 0  ;;  %s1413_s24 = smov [#allocation4]   ;;  %s1343_s28 = scalar_lea.hbm %s1598_s3, 8192 }
   0x2   :  { %s35_s25 = sshll.u32 %s1413_s24, 4  ;;  %p1344_p0 = scmp.ne.s32.totalorder %s1598_s3, %s1343_s28  ;;  %s36_s25 = int_to_ptr.vmem [resolvable:$true] %s35_s25 }
   0x3   :  { %p1347_p1 = scmp.lt.u32.totalorder %s1343_s28, %s1598_s3 }
   0x5   :  { %p1349_p2 = pnand %p1347_p1, %p1344_p0 }
   0x7   :  { %1352 = shalt.err (!%p1349_p2)
}
   0x8   :  { %s1353_s10 = scalar_lea.vmem %s36_s25, 8192  ;;  %p1358_p4 = scmp.lt.s32.totalorder %s36_s25, %s36_s25 }
   0x9   :  { %p1354_p3 = scmp.ne.s32.totalorder %s36_s25, %s1353_s10  ;;  %p1359_p5 = scmp.lt.s32.totalorder %s1353_s10, %s1353_s10 }
   0xb   :  { %p1360_p6 = por %p1359_p5, %p1358_p4 }
   0xd   :  { %p1361_p7 = pnand %p1360_p6, %p1354_p3 }
   0xf   :  { %1364 = shalt.err (!%p1361_p7)
}
  0x10   :  { %s1414_s11 = smov 128   ;;  %s1415_s12 = smov 8  }
  0x11   :  { %41 = dma.hbm_to_vmem [thread:$0]  %s1598_s3, 8192, %s36_s25, [#allocation5], %s1414_s11, %s1414_s11, %s1415_s12  }
  0x12   :  { %s1416_s15 = smov [#allocation2]   ;;  %s1365_s19 = scalar_lea.hbm %s1596_s1, 1536 }
  0x13   :  { %s21_s16 = sshll.u32 %s1416_s15, 4  ;;  %p1366_p8 = scmp.ne.s32.totalorder %s1596_s1, %s1365_s19  ;;  %s22_s16 = int_to_ptr.vmem [resolvable:$true] %s21_s16 }
  0x14   :  { %p1369_p9 = scmp.lt.u32.totalorder %s1365_s19, %s1596_s1 }
  0x16   :  { %p1371_p10 = pnand %p1369_p9, %p1366_p8 }
  0x18   :  { %1374 = shalt.err (!%p1371_p10)
}
  0x19   :  { %s1375_s24 = scalar_lea.vmem %s22_s16, 1536  ;;  %p1380_p12 = scmp.lt.s32.totalorder %s22_s16, %s22_s16 }
  0x1a   :  { %p1376_p11 = scmp.ne.s32.totalorder %s22_s16, %s1375_s24  ;;  %p1381_p13 = scmp.lt.s32.totalorder %s1375_s24, %s1375_s24 }
  0x1c   :  { %p1382_p0 = por %p1381_p13, %p1380_p12 }
  0x1e   :  { %p1383_p1 = pnand %p1382_p0, %p1376_p11 }
  0x20   :  { %1386 = shalt.err (!%p1383_p1)
}
  0x21   :  { %s1417_s3 = smov 512   ;;  %s1418_s25 = smov 32  }
  0x22   :  { %27 = dma.hbm_to_vmem [thread:$0]  %s1596_s1, 1536, %s22_s16, [#allocation3], %s1417_s3, %s1417_s3, %s1418_s25  }
  0x23   :  { %s1419_s28 = smov [#allocation6]   ;;  %s1387_s9 = scalar_lea.hbm %s1600_s5, 8192 }
  0x24   :  { %s49_s29 = sshll.u32 %s1419_s28, 4  ;;  %p1388_p2 = scmp.ne.s32.totalorder %s1600_s5, %s1387_s9  ;;  %s50_s29 = int_to_ptr.vmem [resolvable:$true] %s49_s29 }
  0x25   :  { %p1391_p3 = scmp.lt.u32.totalorder %s1387_s9, %s1600_s5 }
  0x27   :  { %p1393_p4 = pnand %p1391_p3, %p1388_p2 }
  0x29   :  { %1396 = shalt.err (!%p1393_p4)
}
  0x2a   :  { %s1397_s17 = scalar_lea.vmem %s50_s29, 8192  ;;  %p1402_p6 = scmp.lt.s32.totalorder %s50_s29, %s50_s29 }
  0x2b   :  { %p1398_p5 = scmp.ne.s32.totalorder %s50_s29, %s1397_s17  ;;  %p1403_p7 = scmp.lt.s32.totalorder %s1397_s17, %s1397_s17 }
  0x2d   :  { %p1404_p8 = por %p1403_p7, %p1402_p6 }
  0x2f   :  { %p1405_p9 = pnand %p1404_p8, %p1398_p5 }
  0x31   :  { %1408 = shalt.err (!%p1405_p9)
}
  0x32   :  { %55 = dma.hbm_to_vmem [thread:$0]  %s1600_s5, 8192, %s50_s29, [#allocation5], %s1414_s11, %s1414_s11, %s1415_s12  }
  0x33   :  { %1409 = dma.done.wait [#allocation3], 1536  }
  0x34   :  { %1410 = vsyncadd [#allocation3], 4294965760 }
  0x35   :  { %1411 = dma.done.wait [#allocation5], 16384  }
  0x36   :  { %1412 = vsyncadd [#allocation5], 4294950912  ;;  %v1420_v0 = vmov 0.0   ;;  %v69_v1 = vld [vmem:[#allocation2 + $0x8] sm:$0xff]  ;;  %v68_v3 = vld [vmem:[#allocation2] sm:$0xff]  ;;  %vm106_vm0 = vcmask 1043456  }
  0x37   :  { %183 = vmatprep.mubr.f32.mxu0 %v1420_v0  ;;  %254 = vmatprep.mubr.f32.mxu1 %v1420_v0  ;;  %v73_v2 = vld [vmem:[#allocation2 + $0x28] sm:$0xff]  ;;  %v72_v5 = vld [vmem:[#allocation2 + $0x20] sm:$0xff]  ;;  %v71_v8 = vld [vmem:[#allocation2 + $0x18] sm:$0xff]  ;;  %vm102_vm1 = vcmask 162816   ;;  %v1421_v26 = vmov 0.0|0.0   ;;  %vm1422_vm2 = vmmov 0  }
  0x38   :  { %v1165_v4 = vpack.c.bf16 %v73_v2, %v69_v1  ;;  %v1167_v6 = vpack.c.bf16 %v72_v5, %v68_v3  ;;  %v77_v7 = vld [vmem:[#allocation2 + $0x48] sm:$0xf]  ;;  %v75_v9 = vld [vmem:[#allocation2 + $0x38] sm:$0xff]  ;;  %v70_v11 = vld [vmem:[#allocation2 + $0x10] sm:$0xff] }
  0x39   :  { %v1169_v10 = vpack.c.bf16 %v75_v9, %v71_v8  ;;  %v74_v12 = vld [vmem:[#allocation2 + $0x30] sm:$0xff]  ;;  %v79_v14 = vld [vmem:[#allocation2 + $0x58] sm:$0xf]  ;;  %v269_v15 = vld [vmem:[#allocation4] sm:$0xff] }
  0x3a   :  { %1166 = vmatprep.subr.bf16.mxu0 %v1165_v4  ;;  %v1171_v13 = vpack.c.bf16 %v74_v12, %v70_v11  ;;  %v270_v16 = vld [vmem:[#allocation4 + $0x8] sm:$0xff]  ;;  %v76_v17 = vld [vmem:[#allocation2 + $0x40] sm:$0xf]  ;;  %v78_v22 = vld [vmem:[#allocation2 + $0x50] sm:$0xf]  ;;  %v82_v4 = vlaneseq }
  0x3b   :  { %1168 = vmatpush1.bf16.msra.mxu0 %v1167_v6  ;;  %1170 = vmatprep.subr.bf16.mxu1 %v1169_v10  ;;  %v365_v18 = vld [vmem:[#allocation4 + $0x80] sm:$0xff]  ;;  %v366_v19 = vld [vmem:[#allocation4 + $0x88] sm:$0xff]  ;;  %v1174_v21 = vpack.c.bf16 %v270_v16, %v269_v15  ;;  %v271_v23 = vld [vmem:[#allocation4 + $0x10] sm:$0xff] }
  0x3c   :  { %873 = vmatprep.subr.msk.mxu0 %vm106_vm0, %v77_v7  ;;  %v67_v20 = vld [vmem:[%s1595_s0] sm:$0xff]  ;;  %1172 = vmatpush1.bf16.msra.mxu1 %v1171_v13  ;;  %v272_v24 = vld [vmem:[#allocation4 + $0x18] sm:$0xff]  ;;  %v1198_v25 = vpack.c.bf16 %v366_v19, %v365_v18  ;;  %v367_v27 = vld [vmem:[#allocation4 + $0x90] sm:$0xff]  ;;  %v1538_v5 = vshrl.u32 %v82_v4, 7 }
  0x3d   :  { %876 = vmatprep.subr.msk.mxu1 %vm106_vm0, %v79_v14  ;;  %v368_v28 = vld [vmem:[#allocation4 + $0x98] sm:$0xff]  ;;  %v1177_v29 = vpack.c.bf16 %v272_v24, %v271_v23  ;;  %v273_v30 = vld [vmem:[#allocation4 + $0x20] sm:$0xff]  ;;  %v274_v31 = vld [vmem:[#allocation4 + $0x28] sm:$0xff] }
  0x3e   :  { %v1201_v32 = vpack.c.bf16 %v368_v28, %v367_v27  ;;  %v369_v33 = vld [vmem:[#allocation4 + $0xa0] sm:$0xff]  ;;  %v370_v34 = vld [vmem:[#allocation4 + $0xa8] sm:$0xff]  ;;  %v1180_v35 = vpack.c.bf16 %v274_v31, %v273_v30  ;;  %v275_v36 = vld [vmem:[#allocation4 + $0x30] sm:$0xff]  ;;  %v84_v6 = vsub.s32 0, %v1538_v5  ;;  %v88_v8 = vsub.s32 1, %v1538_v5 }
  0x3f   :  { %874 = vmatpush1.msk.msra.mxu0 %vm106_vm0, %v76_v17  ;;  %v276_v37 = vld [vmem:[#allocation4 + $0x38] sm:$0xff]  ;;  %v1204_v38 = vpack.c.bf16 %v370_v34, %v369_v33  ;;  %v371_v39 = vld [vmem:[#allocation4 + $0xb0] sm:$0xff]  ;;  %v277_v42 = vld [vmem:[#allocation4 + $0x40] sm:$0xff] }
  0x40   :  { %875 = vmatmul.mubr.msk.f32.vlgmr.msra.gmra.mrb[0].mxu0 %vm102_vm1, %v67_v20  ;;  %1173 = vmatprep.subr.bf16.mxu0 %v1421_v26  ;;  %v372_v40 = vld [vmem:[#allocation4 + $0xb8] sm:$0xff]  ;;  %v1183_v41 = vpack.c.bf16 %v276_v37, %v275_v36  ;;  %v278_v43 = vld [vmem:[#allocation4 + $0x48] sm:$0xff]  ;;  %v373_v45 = vld [vmem:[#allocation4 + $0xc0] sm:$0xff] }
  0x41   :  { %877 = vmatpush1.msk.msra.mxu1 %vm106_vm0, %v78_v22  ;;  %1175 = vmatpush3.bf16.msra.mxu0 %v1174_v21  ;;  %v1207_v44 = vpack.c.bf16 %v372_v40, %v371_v39  ;;  %v374_v46 = vld [vmem:[#allocation4 + $0xc8] sm:$0xff]  ;;  %v1186_v47 = vpack.c.bf16 %v278_v43, %v277_v42  ;;  %v279_v48 = vld [vmem:[#allocation4 + $0x50] sm:$0xff]  ;;  %v280_v49 = vld [vmem:[#allocation4 + $0x58] sm:$0xff] }
  0x42   :  { %878 = vmatmul.mubr.msk.f32.vlgmr.msra.gmra.mrb[0].mxu1 %vm102_vm1, %v67_v20  ;;  %1197 = vmatprep.subr.bf16.mxu1 %v1421_v26  ;;  %v1210_v50 = vpack.c.bf16 %v374_v46, %v373_v45  ;;  %v375_v51 = vld [vmem:[#allocation4 + $0xd0] sm:$0xff]  ;;  %v376_v52 = vld [vmem:[#allocation4 + $0xd8] sm:$0xff]  ;;  %v1189_v53 = vpack.c.bf16 %v280_v49, %v279_v48  ;;  %v281_v54 = vld [vmem:[#allocation4 + $0x60] sm:$0xff] }
  0x43   :  { %1199 = vmatpush3.bf16.msra.mxu1 %v1198_v25  ;;  %1176 = vmatprep.subr.bf16.mxu0 %v1421_v26  ;;  %v282_v55 = vld [vmem:[#allocation4 + $0x68] sm:$0xff]  ;;  %v1213_v56 = vpack.c.bf16 %v376_v52, %v375_v51  ;;  %v377_v58 = vld [vmem:[#allocation4 + $0xe0] sm:$0xff]  ;;  %v283_v61 = vld [vmem:[#allocation4 + $0x70] sm:$0xff] }
  0x44   :  { %1200 = vmatprep.subr.bf16.mxu1 %v1421_v26  ;;  %v1192_v57 = vpack.c.bf16 %v282_v55, %v281_v54  ;;  %v378_v59 = vld [vmem:[#allocation4 + $0xe8] sm:$0xff]  ;;  %v284_v62 = vld [vmem:[#allocation4 + $0x78] sm:$0xff]  ;;  %v379_v1 = vld [vmem:[#allocation4 + $0xf0] sm:$0xff]  ;;  %1057 = vmatprep.mubr.msk.f32.mxu0 %vm1422_vm2, %v1420_v0 }
  0x45   :  { %1178 = vmatpush3.bf16.msra.mxu0 %v1177_v29  ;;  %v1216_v60 = vpack.c.bf16 %v378_v59, %v377_v58  ;;  %v1195_v63 = vpack.c.bf16 %v284_v62, %v283_v61  ;;  %v380_v2 = vld [vmem:[#allocation4 + $0xf8] sm:$0xff]  ;;  %1092 = vmatprep.mubr.msk.f32.mxu1 %vm1422_vm2, %v1420_v0  ;;  %v1544_v7 = vld [vmem:[%s1597_s2] sm:$0xf]  ;;  %v463_v15 = vld [vmem:[#allocation4 + $0x108] sm:$0xff] }
  0x46   :  { %1179 = vmatprep.subr.bf16.mxu0 %v1421_v26  ;;  %v1219_v3 = vpack.c.bf16 %v380_v2, %v379_v1  ;;  %v85_v9 = vrot.slane %v1544_v7, %v84_v6  ;;  %v89_v10 = vrot.slane %v1544_v7, %v88_v8  ;;  %v462_v14 = vld [vmem:[#allocation4 + $0x100] sm:$0xff]  ;;  %v560_v18 = vld [vmem:[#allocation4 + $0x188] sm:$0xff]  ;;  %v464_v27 = vld [vmem:[#allocation4 + $0x110] sm:$0xff] }
  0x47   :  { %1202 = vmatpush3.bf16.msra.mxu1 %v1201_v32  ;;  %v559_v17 = vld [vmem:[#allocation4 + $0x180] sm:$0xff]  ;;  %v1222_v23 = vpack.c.bf16 %v463_v15, %v462_v14  ;;  %v465_v28 = vld [vmem:[#allocation4 + $0x118] sm:$0xff]  ;;  %v561_v30 = vld [vmem:[#allocation4 + $0x190] sm:$0xff] }
  0x48   :  { %1203 = vmatprep.subr.bf16.mxu1 %v1421_v26  ;;  %v1246_v25 = vpack.c.bf16 %v560_v18, %v559_v17  ;;  %v562_v31 = vld [vmem:[#allocation4 + $0x198] sm:$0xff]  ;;  %v1225_v32 = vpack.c.bf16 %v465_v28, %v464_v27  ;;  %v466_v34 = vld [vmem:[#allocation4 + $0x120] sm:$0xff]  ;;  %v564_v37 = vld [vmem:[#allocation4 + $0x1a8] sm:$0xff] }
  0x49   :  { %1181 = vmatpush3.bf16.msra.mxu0 %v1180_v35  ;;  %v1249_v33 = vpack.c.bf16 %v562_v31, %v561_v30  ;;  %v467_v35 = vld [vmem:[#allocation4 + $0x128] sm:$0xff]  ;;  %v563_v36 = vld [vmem:[#allocation4 + $0x1a0] sm:$0xff]  ;;  %v468_v40 = vld [vmem:[#allocation4 + $0x130] sm:$0xff] }
  0x4a   :  { %1182 = vmatprep.subr.bf16.mxu0 %v1421_v26  ;;  %v1252_v39 = vpack.c.bf16 %v564_v37, %v563_v36  ;;  %v565_v42 = vld [vmem:[#allocation4 + $0x1b0] sm:$0xff]  ;;  %v566_v43 = vld [vmem:[#allocation4 + $0x1b8] sm:$0xff]  ;;  %v470_v46 = vld [vmem:[#allocation4 + $0x140] sm:$0xff] }
  0x4b   :  { %1205 = vmatpush3.bf16.msra.mxu1 %v1204_v38  ;;  %v1228_v38 = vpack.c.bf16 %v467_v35, %v466_v34  ;;  %v1255_v45 = vpack.c.bf16 %v566_v43, %v565_v42  ;;  %v568_v48 = vld [vmem:[#allocation4 + $0x1c8] sm:$0xff]  ;;  %v472_v51 = vld [vmem:[#allocation4 + $0x150] sm:$0xff]  ;;  %v473_v52 = vld [vmem:[#allocation4 + $0x158] sm:$0xff] }
  0x4c   :  { %1206 = vmatprep.subr.bf16.mxu1 %v1421_v26  ;;  %v569_v54 = vld [vmem:[#allocation4 + $0x1d0] sm:$0xff]  ;;  %v570_v55 = vld [vmem:[#allocation4 + $0x1d8] sm:$0xff]  ;;  %v475_v61 = vld [vmem:[#allocation4 + $0x168] sm:$0xff] }
  0x4d   :  { %1184 = vmatpush3.bf16.msra.mxu0 %v1183_v41  ;;  %v469_v41 = vld [vmem:[#allocation4 + $0x138] sm:$0xff]  ;;  %v1261_v59 = vpack.c.bf16 %v570_v55, %v569_v54  ;;  %v572_v1 = vld [vmem:[#allocation4 + $0x1e8] sm:$0xff]  ;;  %v573_v8 = vld [vmem:[#allocation4 + $0x1f0] sm:$0xff] }
  0x4e   :  { %1185 = vmatprep.subr.bf16.mxu0 %v1421_v26  ;;  %v477_v6 = vld [vmem:[#allocation4 + $0x178] sm:$0xff]  ;;  %v656_v17 = vld [vmem:[#allocation6 + $0x8] sm:$0xff]  ;;  %v675_v28 = vld [vmem:[#allocation6 + $0xa0] sm:$0xff] }
  0x4f   :  { %1208 = vmatpush3.bf16.msra.mxu1 %v1207_v44  ;;  %v1231_v44 = vpack.c.bf16 %v469_v41, %v468_v40  ;;  %v678_v34 = vld [vmem:[#allocation6 + $0xb8] sm:$0xff]  ;;  %v661_v37 = vld [vmem:[#allocation6 + $0x30] sm:$0xff]  ;;  %v680_v40 = vld [vmem:[#allocation6 + $0xc8] sm:$0xff] }
  0x50   :  { %1209 = vmatprep.subr.bf16.mxu1 %v1421_v26  ;;  %v663_v43 = vld [vmem:[#allocation6 + $0x40] sm:$0xff]  ;;  %v668_v55 = vld [vmem:[#allocation6 + $0x68] sm:$0xff] }
  0x51   :  { %1187 = vmatpush3.bf16.msra.mxu0 %v1186_v47  ;;  %v567_v47 = vld [vmem:[#allocation4 + $0x1c0] sm:$0xff] }
  0x52   :  { %1188 = vmatprep.subr.bf16.mxu0 %v1421_v26  ;;  %v667_v54 = vld [vmem:[#allocation6 + $0x60] sm:$0xff] }
  0x53   :  { %1211 = vmatpush3.bf16.msra.mxu1 %v1210_v50  ;;  %v1258_v50 = vpack.c.bf16 %v568_v48, %v567_v47  ;;  %v665_v48 = vld [vmem:[#allocation6 + $0x50] sm:$0xff] }
  0x54   :  { %1212 = vmatprep.subr.bf16.mxu1 %v1421_v26 }
  0x55   :  { %1190 = vmatpush3.bf16.msra.mxu0 %v1189_v53  ;;  %v92_v53 = vsub.s32 2, %v1538_v5 }
  0x56   :  { %1191 = vmatprep.subr.bf16.mxu0 %v1421_v26 }
  0x57   :  { %1214 = vmatpush3.bf16.msra.mxu1 %v1213_v56  ;;  %v96_v56 = vsub.s32 3, %v1538_v5  ;;  %v93_v58 = vrot.slane %v1544_v7, %v92_v53  ;;  %v476_v5 = vld [vmem:[#allocation4 + $0x170] sm:$0xff] }
  0x58   :  { %1215 = vmatprep.subr.bf16.mxu1 %v1421_v26 }
  0x59   :  { %1193 = vmatpush3.bf16.msra.mxu0 %v1192_v57  ;;  %v1237_v57 = vpack.c.bf16 %v473_v52, %v472_v51  ;;  %v97_v62 = vrot.slane %v1544_v7, %v96_v56  ;;  %v672_v7 = vld [vmem:[#allocation6 + $0x88] sm:$0xff]  ;;  %v683_v51 = vld [vmem:[#allocation6 + $0xe0] sm:$0xff]  ;;  %v1295_v56 = vpack.c.bf16 %v668_v55, %v667_v54 }
  0x5a   :  { %1194 = vmatprep.subr.bf16.mxu0 %v1421_v26  ;;  %v684_v52 = vld [vmem:[#allocation6 + $0xe8] sm:$0xff] }
  0x5b   :  { %1217 = vmatpush3.bf16.msra.mxu1 %v1216_v60  ;;  %v474_v60 = vld [vmem:[#allocation4 + $0x160] sm:$0xff]  ;;  %v1293_v53 = vpack.c.bf16 %v684_v52, %v683_v51 }
  0x5c   :  { %1218 = vmatprep.subr.bf16.mxu1 %v1421_v26  ;;  %v1240_v2 = vpack.c.bf16 %v475_v61, %v474_v60  ;;  %v669_v60 = vld [vmem:[#allocation6 + $0x70] sm:$0xff]  ;;  %v670_v61 = vld [vmem:[#allocation6 + $0x78] sm:$0xff] }
  0x5d   :  { %1196 = vmatpush3.bf16.msra.mxu0 %v1195_v63  ;;  %v571_v63 = vld [vmem:[#allocation4 + $0x1e0] sm:$0xff] }
  0x5e   :  { %1221 = vmatprep.subr.bf16.mxu0 %v1421_v26  ;;  %v1264_v4 = vpack.c.bf16 %v572_v1, %v571_v63  ;;  %v703_v63 = vld [vmem:[#allocation6 + $0x180] sm:$0xff]  ;;  %v704_v1 = vld [vmem:[#allocation6 + $0x188] sm:$0xff] }
  0x5f   :  { %1220 = vmatpush3.bf16.msra.mxu1 %v1219_v3 }
  0x60   :  { %1245 = vmatprep.subr.bf16.mxu1 %v1421_v26 }
 0x113   :  { %v185_v11 = vpop.f32.mrb[0].mxu0 }
 0x114   :  { %v186_v12 = vadd.f32 %v185_v11, %v85_v9  ;;  %v187_v13 = vpop.f32.mrb[1].mxu0  ;;  %v671_v11 = vld [vmem:[#allocation6 + $0x80] sm:$0xff] }
 0x115   :  { %v188_v16 = vadd.f32 %v187_v13, %v89_v10  ;;  %v1549_v19 = vpop.f32.mrb[0].mxu1  ;;  %v574_v10 = vld [vmem:[#allocation4 + $0x1f8] sm:$0xff]  ;;  %v1269_v15 = vpack.c.bf16 %v672_v7, %v671_v11  ;;  %v707_v7 = vld [vmem:[#allocation6 + $0x1a0] sm:$0xff] }
 0x116   :  { %v261_v20 = vmul.f32 0.01, %v186_v12  ;;  %v1551_v21 = vpop.f32.mrb[1].mxu1  ;;  %v257_v3 = vadd.f32 %v1549_v19, %v93_v58  ;;  %v1267_v14 = vpack.c.bf16 %v574_v10, %v573_v8  ;;  %v673_v19 = vld [vmem:[#allocation6 + $0x90] sm:$0xff]  ;;  %v686_v58 = vld [vmem:[#allocation6 + $0xf8] sm:$0xff] }
 0x117   :  { %v262_v22 = vmul.f32 0.01, %v188_v16  ;;  %v259_v9 = vadd.f32 %v1551_v21, %v97_v62  ;;  %v1299_v62 = vpack.c.bf16 %v670_v61, %v669_v60  ;;  %v706_v8 = vld [vmem:[#allocation6 + $0x198] sm:$0xff]  ;;  %v885_v60 = vld [vmem:[%s1599_s4 + $0x3] ss:$0 sm:$0xff] }
 0x118   :  { %v265_v24 = vmax.f32 %v186_v12, %v261_v20  ;;  %v1243_v12 = vpack.c.bf16 %v477_v6, %v476_v5  ;;  %v263_v13 = vmul.f32 0.01, %v257_v3  ;;  %v674_v20 = vld [vmem:[#allocation6 + $0x98] sm:$0xff]  ;;  %v705_v6 = vld [vmem:[#allocation6 + $0x190] sm:$0xff] }
 0x119   :  { %v266_v29 = vmax.f32 %v188_v16, %v262_v22  ;;  %v655_v16 = vld [vmem:[#allocation6] sm:$0xff]  ;;  %v264_v18 = vmul.f32 0.01, %v259_v9  ;;  %v1305_v10 = vpack.c.bf16 %v706_v8, %v705_v6  ;;  %v690_v11 = vld [vmem:[#allocation6 + $0x118] sm:$0xff] }
 0x11a   :  { %1058 = vmatmul.mubr.f32.vlgmr.msra.gmra.mrb[2].mxu0 %v265_v24  ;;  %v1271_v21 = vpack.c.bf16 %v656_v17, %v655_v16  ;;  %v267_v22 = vmax.f32 %v257_v3, %v263_v13  ;;  %v657_v24 = vld [vmem:[#allocation6 + $0x10] sm:$0xff]  ;;  %v687_v3 = vld [vmem:[#allocation6 + $0x100] sm:$0xff]  ;;  %v692_v16 = vld [vmem:[#allocation6 + $0x128] sm:$0xff] }
 0x11b   :  { %1223 = vmatpush3.bf16.msra.mxu0 %v1222_v23  ;;  %1093 = vmatmul.mubr.f32.vlgmr.msra.gmra.mrb[2].mxu1 %v266_v29  ;;  %v1273_v23 = vpack.c.bf16 %v674_v20, %v673_v19  ;;  %v268_v27 = vmax.f32 %v259_v9, %v264_v18  ;;  %v676_v29 = vld [vmem:[#allocation6 + $0xa8] sm:$0xff]  ;;  %v689_v9 = vld [vmem:[#allocation6 + $0x110] sm:$0xff]  ;;  %v710_v18 = vld [vmem:[#allocation6 + $0x1b8] sm:$0xff] }
 0x11c   :  { %1247 = vmatpush3.bf16.msra.mxu1 %v1246_v25  ;;  %1224 = vmatprep.subr.bf16.mxu0 %v1421_v26  ;;  %v658_v25 = vld [vmem:[#allocation6 + $0x18] sm:$0xff]  ;;  %v1277_v31 = vpack.c.bf16 %v676_v29, %v675_v28  ;;  %v1307_v13 = vpack.c.bf16 %v690_v11, %v689_v9  ;;  %v709_v17 = vld [vmem:[#allocation6 + $0x1b0] sm:$0xff]  ;;  %v695_v28 = vld [vmem:[#allocation6 + $0x140] sm:$0xff] }
 0x11d   :  { %1248 = vmatprep.subr.bf16.mxu1 %v1421_v26  ;;  %1127 = vmatprep.mubr.msk.f32.mxu0 %vm1422_vm2, %v1420_v0  ;;  %v1275_v30 = vpack.c.bf16 %v658_v25, %v657_v24  ;;  %v1313_v20 = vpack.c.bf16 %v710_v18, %v709_v17  ;;  %v712_v24 = vld [vmem:[#allocation6 + $0x1c8] sm:$0xff] }
 0x11e   :  { %1162 = vmatprep.mubr.msk.f32.mxu1 %vm1422_vm2, %v1420_v0  ;;  %v471_v0 = vld [vmem:[#allocation4 + $0x148] sm:$0xff] }
 0x11f   :  { %1226 = vmatpush3.bf16.msra.mxu0 %v1225_v32  ;;  %v1234_v49 = vpack.c.bf16 %v471_v0, %v470_v46  ;;  %v660_v32 = vld [vmem:[#allocation6 + $0x28] sm:$0xff]  ;;  %v682_v46 = vld [vmem:[#allocation6 + $0xd8] sm:$0xff] }
 0x120   :  { %1250 = vmatpush3.bf16.msra.mxu1 %v1249_v33  ;;  %1227 = vmatprep.subr.bf16.mxu0 %v1421_v26  ;;  %v677_v33 = vld [vmem:[#allocation6 + $0xb0] sm:$0xff]  ;;  %v696_v29 = vld [vmem:[#allocation6 + $0x148] sm:$0xff] }
 0x121   :  { %1251 = vmatprep.subr.bf16.mxu1 %v1421_v26  ;;  %v1281_v36 = vpack.c.bf16 %v678_v34, %v677_v33  ;;  %v697_v33 = vld [vmem:[#allocation6 + $0x150] sm:$0xff]  ;;  %v698_v34 = vld [vmem:[#allocation6 + $0x158] sm:$0xff] }
 0x123   :  { %1229 = vmatpush3.bf16.msra.mxu0 %v1228_v38  ;;  %v662_v38 = vld [vmem:[#allocation6 + $0x38] sm:$0xff] }
 0x124   :  { %1253 = vmatpush3.bf16.msra.mxu1 %v1252_v39  ;;  %1230 = vmatprep.subr.bf16.mxu0 %v1421_v26  ;;  %v679_v39 = vld [vmem:[#allocation6 + $0xc0] sm:$0xff]  ;;  %v1283_v41 = vpack.c.bf16 %v662_v38, %v661_v37  ;;  %v716_v37 = vld [vmem:[#allocation6 + $0x1e8] sm:$0xff] }
 0x125   :  { %1254 = vmatprep.subr.bf16.mxu1 %v1421_v26  ;;  %v1285_v42 = vpack.c.bf16 %v680_v40, %v679_v39  ;;  %v699_v39 = vld [vmem:[#allocation6 + $0x160] sm:$0xff]  ;;  %v700_v40 = vld [vmem:[#allocation6 + $0x168] sm:$0xff] }
 0x127   :  { %1232 = vmatpush3.bf16.msra.mxu0 %v1231_v44  ;;  %v664_v44 = vld [vmem:[#allocation6 + $0x48] sm:$0xff] }
 0x128   :  { %1256 = vmatpush3.bf16.msra.mxu1 %v1255_v45  ;;  %1233 = vmatprep.subr.bf16.mxu0 %v1421_v26  ;;  %v681_v45 = vld [vmem:[#allocation6 + $0xd0] sm:$0xff]  ;;  %v1287_v0 = vpack.c.bf16 %v664_v44, %v663_v43  ;;  %v718_v43 = vld [vmem:[#allocation6 + $0x1f8] sm:$0xff] }
 0x129   :  { %1257 = vmatprep.subr.bf16.mxu1 %v1421_v26  ;;  %v1289_v47 = vpack.c.bf16 %v682_v46, %v681_v45  ;;  %v701_v45 = vld [vmem:[#allocation6 + $0x170] sm:$0xff]  ;;  %v702_v46 = vld [vmem:[#allocation6 + $0x178] sm:$0xff] }
 0x12b   :  { %1235 = vmatpush3.bf16.msra.mxu0 %v1234_v49  ;;  %v666_v49 = vld [vmem:[#allocation6 + $0x58] sm:$0xff] }
 0x12c   :  { %1259 = vmatpush3.bf16.msra.mxu1 %v1258_v50  ;;  %1236 = vmatprep.subr.bf16.mxu0 %v1421_v26  ;;  %v1291_v50 = vpack.c.bf16 %v666_v49, %v665_v48  ;;  %v881_v48 = vld [vmem:[%s1599_s4 + $0x1] ss:$0 sm:$0xff] }
 0x12d   :  { %1260 = vmatprep.subr.bf16.mxu1 %v1421_v26 }
 0x12f   :  { %1238 = vmatpush3.bf16.msra.mxu0 %v1237_v57  ;;  %v685_v57 = vld [vmem:[#allocation6 + $0xf0] sm:$0xff] }
 0x130   :  { %1262 = vmatpush3.bf16.msra.mxu1 %v1261_v59  ;;  %1239 = vmatprep.subr.bf16.mxu0 %v1421_v26  ;;  %v1297_v59 = vpack.c.bf16 %v686_v58, %v685_v57 }
 0x131   :  { %1263 = vmatprep.subr.bf16.mxu1 %v1421_v26 }
 0x133   :  { %1241 = vmatpush3.bf16.msra.mxu0 %v1240_v2  ;;  %v1301_v2 = vpack.c.bf16 %v704_v1, %v703_v63 }
 0x134   :  { %1265 = vmatpush3.bf16.msra.mxu1 %v1264_v4  ;;  %1242 = vmatprep.subr.bf16.mxu0 %v1421_v26  ;;  %v688_v4 = vld [vmem:[#allocation6 + $0x108] sm:$0xff] }
 0x135   :  { %1266 = vmatprep.subr.bf16.mxu1 %v1421_v26  ;;  %v659_v26 = vld [vmem:[#allocation6 + $0x20] sm:$0xff]  ;;  %v1303_v5 = vpack.c.bf16 %v688_v4, %v687_v3 }
 0x136   :  { %v1279_v35 = vpack.c.bf16 %v660_v32, %v659_v26  ;;  %v1319_v26 = vpack.c.bf16 %v696_v29, %v695_v28 }
 0x137   :  { %1244 = vmatpush3.bf16.msra.mxu0 %v1243_v12  ;;  %v708_v12 = vld [vmem:[#allocation6 + $0x1a8] sm:$0xff] }
 0x138   :  { %1268 = vmatpush3.bf16.msra.mxu1 %v1267_v14  ;;  %1270 = vmatprep.subr.bf16.mxu0 %v1269_v15  ;;  %v1309_v14 = vpack.c.bf16 %v708_v12, %v707_v7  ;;  %v691_v15 = vld [vmem:[#allocation6 + $0x120] sm:$0xff] }
 0x139   :  { %1302 = vmatprep.subr.bf16.mxu1 %v1301_v2  ;;  %v1311_v19 = vpack.c.bf16 %v692_v16, %v691_v15  ;;  %v886_v7 = vld [vmem:[%s1601_s6] ss:$0 sm:$0xff] }
 0x13a   :  { %1128 = vmatmul.mubr.f32.vlgmr.msra.gmra.mrb[4].mxu0 %v267_v22  ;;  %v694_v22 = vld [vmem:[#allocation6 + $0x138] sm:$0xff] }
 0x13b   :  { %1163 = vmatmul.mubr.f32.vlgmr.msra.gmra.mrb[4].mxu1 %v268_v27  ;;  %1272 = vmatpush3.bf16.msra.mxu0 %v1271_v21  ;;  %v693_v21 = vld [vmem:[#allocation6 + $0x130] sm:$0xff] }
 0x13c   :  { %1274 = vmatprep.subr.bf16.mxu0 %v1273_v23  ;;  %1304 = vmatpush3.bf16.msra.mxu1 %v1303_v5  ;;  %v711_v23 = vld [vmem:[#allocation6 + $0x1c0] sm:$0xff]  ;;  %v1315_v25 = vpack.c.bf16 %v694_v22, %v693_v21 }
 0x13d   :  { %1306 = vmatprep.subr.bf16.mxu1 %v1305_v10  ;;  %v1317_v27 = vpack.c.bf16 %v712_v24, %v711_v23 }
 0x13f   :  { %1276 = vmatpush3.bf16.msra.mxu0 %v1275_v30  ;;  %v713_v30 = vld [vmem:[#allocation6 + $0x1d0] sm:$0xff] }
 0x140   :  { %1278 = vmatprep.subr.bf16.mxu0 %v1277_v31  ;;  %1308 = vmatpush3.bf16.msra.mxu1 %v1307_v13  ;;  %v714_v31 = vld [vmem:[#allocation6 + $0x1d8] sm:$0xff] }
 0x141   :  { %1310 = vmatprep.subr.bf16.mxu1 %v1309_v14  ;;  %v1321_v32 = vpack.c.bf16 %v714_v31, %v713_v30 }
 0x143   :  { %1280 = vmatpush3.bf16.msra.mxu0 %v1279_v35  ;;  %v1323_v35 = vpack.c.bf16 %v698_v34, %v697_v33 }
 0x144   :  { %1282 = vmatprep.subr.bf16.mxu0 %v1281_v36  ;;  %1312 = vmatpush3.bf16.msra.mxu1 %v1311_v19  ;;  %v715_v36 = vld [vmem:[#allocation6 + $0x1e0] sm:$0xff] }
 0x145   :  { %1314 = vmatprep.subr.bf16.mxu1 %v1313_v20  ;;  %v1325_v38 = vpack.c.bf16 %v716_v37, %v715_v36 }
 0x147   :  { %1284 = vmatpush3.bf16.msra.mxu0 %v1283_v41  ;;  %v1327_v41 = vpack.c.bf16 %v700_v40, %v699_v39 }
 0x148   :  { %1286 = vmatprep.subr.bf16.mxu0 %v1285_v42  ;;  %1316 = vmatpush3.bf16.msra.mxu1 %v1315_v25  ;;  %v717_v42 = vld [vmem:[#allocation6 + $0x1f0] sm:$0xff] }
 0x149   :  { %1318 = vmatprep.subr.bf16.mxu1 %v1317_v27  ;;  %v1329_v44 = vpack.c.bf16 %v718_v43, %v717_v42 }
 0x14b   :  { %1288 = vmatpush3.bf16.msra.mxu0 %v1287_v0  ;;  %v1331_v0 = vpack.c.bf16 %v702_v46, %v701_v45 }
 0x14c   :  { %1290 = vmatprep.subr.bf16.mxu0 %v1289_v47  ;;  %1320 = vmatpush3.bf16.msra.mxu1 %v1319_v26  ;;  %v879_v47 = vld [vmem:[%s1599_s4] ss:$0 sm:$0xff] }
 0x14d   :  { %1322 = vmatprep.subr.bf16.mxu1 %v1321_v32 }
 0x14f   :  { %1292 = vmatpush3.bf16.msra.mxu0 %v1291_v50 }
 0x150   :  { %1294 = vmatprep.subr.bf16.mxu0 %v1293_v53  ;;  %1324 = vmatpush3.bf16.msra.mxu1 %v1323_v35 }
 0x151   :  { %1326 = vmatprep.subr.bf16.mxu1 %v1325_v38 }
 0x153   :  { %1296 = vmatpush3.bf16.msra.mxu0 %v1295_v56 }
 0x154   :  { %1298 = vmatprep.subr.bf16.mxu0 %v1297_v59  ;;  %1328 = vmatpush3.bf16.msra.mxu1 %v1327_v41  ;;  %v883_v59 = vld [vmem:[%s1599_s4 + $0x2] ss:$0 sm:$0xff] }
 0x155   :  { %1330 = vmatprep.subr.bf16.mxu1 %v1329_v44 }
 0x157   :  { %1300 = vmatpush3.bf16.msra.mxu0 %v1299_v62 }
 0x158   :  { %1332 = vmatpush3.bf16.msra.mxu1 %v1331_v0 }
 0x1ed   :  { %v358_v49 = vpop.f32.mrb[2].mxu0 }
 0x1ee   :  { %v359_v50 = vadd.f32 %v879_v47, %v358_v49  ;;  %v1059_v51 = vpop.f32.mrb[3].mxu0  ;;  %v455_v52 = vpop.f32.mrb[2].mxu1 }
 0x1ef   :  { %v456_v53 = vadd.f32 %v881_v48, %v455_v52  ;;  %v1094_v54 = vpop.f32.mrb[3].mxu1 }
 0x1f0   :  { %v362_v55 = vmul.f32 0.01, %v359_v50 }
 0x1f1   :  { %v459_v56 = vmul.f32 0.01, %v456_v53 }
 0x1f2   :  { %v363_v58 = vmax.f32 %v359_v50, %v362_v55 }
 0x1f3   :  { %v460_v57 = vmax.f32 %v456_v53, %v459_v56 }
 0x1f5   :  { %790 = vmatprep.mubr.f32.mxu0 %v460_v57 }
 0x1f6   :  { %791 = vmatmul.mubr.f32.vlgmr.msra.gmra.mrb[6].mxu0 %v363_v58 }
 0x20d   :  { %v552_v61 = vpop.f32.mrb[4].mxu0 }
 0x20e   :  { %v553_v62 = vadd.f32 %v883_v59, %v552_v61  ;;  %v1129_v63 = vpop.f32.mrb[5].mxu0  ;;  %v649_v1 = vpop.f32.mrb[4].mxu1 }
 0x20f   :  { %v650_v2 = vadd.f32 %v885_v60, %v649_v1  ;;  %v1164_v3 = vpop.f32.mrb[5].mxu1 }
 0x210   :  { %v556_v4 = vmul.f32 0.01, %v553_v62 }
 0x211   :  { %v653_v5 = vmul.f32 0.01, %v650_v2 }
 0x212   :  { %v557_v8 = vmax.f32 %v553_v62, %v556_v4 }
 0x213   :  { %v654_v6 = vmax.f32 %v650_v2, %v653_v5 }
 0x215   :  { %860 = vmatprep.mubr.f32.mxu1 %v654_v6 }
 0x216   :  { %861 = vmatmul.mubr.f32.vlgmr.msra.gmra.mrb[6].mxu1 %v557_v8 }
 0x2c9   :  { %v987_v9 = vpop.f32.mrb[6].mxu0 }
 0x2ca   :  { %v988_v10 = vpop.f32.mrb[7].mxu0 }
 0x2cb   :  { %v989_v11 = vadd.f32 %v988_v10, %v987_v9 }
 0x2cd   :  { %v793_v14 = vadd.f32 %v989_v11, %v886_v7 }
 0x2e9   :  { %v1022_v12 = vpop.f32.mrb[6].mxu1 }
 0x2ea   :  { %v1023_v13 = vpop.f32.mrb[7].mxu1 }
 0x2eb   :  { %v1024_v15 = vadd.f32 %v1023_v13, %v1022_v12 }
 0x2ed   :  { %v863_v16 = vadd.f32 %v1024_v15, %v793_v14 }
 0x2ef   :  { %866 = vst [vmem:[%s1602_s7] sm:$0xff] %v863_v16 }
 0x2f0   :  { %871 = vsyncpa [#allocation3], 1 }
 0x2f1   :  { %872 = vsyncpa [#allocation5], 1 }

</bundles_post_ra>
